<compile_context>
chip_gen: v5e
topology: v5e:2x2
jax: 0.10.0
libtpu: 0.0.40
codegen_flags: <defaults>
</compile_context>

<pallas_src>
from functools import partial

import jax
import jax.numpy as jnp
from jax.experimental import pallas as pl
from jax.experimental.pallas import tpu as pltpu

LANE = 128      # lane width: pad every channel axis to this
SUBLANE = 8     # sublane width: pad node / graph counts to a multiple of this


def _round_up(n, m):
    return (n + m - 1) // m * m


# ------------------------------- fused kernel -------------------------------

def _fused_forward_kernel(adj_ref, pool_ref, x_ref,
                          wc1_ref, bc1_ref, wc2_ref, bc2_ref, wc3_ref, bc3_ref,
                          wl1_ref, bl1_ref, wl2_ref, bl2_ref, wlo_ref, blo_ref,
                          o_ref):
    """Entire Model_1 forward, one launch, everything VMEM-resident."""
    adj = adj_ref[...]                      # (Np, Np) row-normalized mean-agg matrix

    def conv(h, wc_ref, bc_ref, relu):
        # GraphConv(mean): aggregation matmul + one fused MXU matmul.
        agg = jnp.dot(adj, h, preferred_element_type=jnp.float32)            # (Np, 128)
        xa = jnp.concatenate([agg, h], axis=1)                               # (Np, 256), 128-aligned
        out = jnp.dot(xa, wc_ref[...], preferred_element_type=jnp.float32) + bc_ref[...]
        return jnp.maximum(out, 0.0) if relu else out

    h = conv(x_ref[...], wc1_ref, bc1_ref, True)
    h = conv(h, wc2_ref, bc2_ref, True)
    h = conv(h, wc3_ref, bc3_ref, False)

    # global_mean_pool as a matmul with the normalized one-hot pooling matrix.
    g = jnp.dot(pool_ref[...], h, preferred_element_type=jnp.float32)        # (Gp, 128)

    # F.dropout(p=0.5, training=False) -> identity in eval mode.
    g = jnp.maximum(
        jnp.dot(g, wl1_ref[...], preferred_element_type=jnp.float32) + bl1_ref[...], 0.0)
    g = jnp.maximum(
        jnp.dot(g, wl2_ref[...], preferred_element_type=jnp.float32) + bl2_ref[...], 0.0)
    o_ref[...] = jnp.dot(g, wlo_ref[...], preferred_element_type=jnp.float32) + blo_ref[...]


# ------------------------------ wrapper helpers ------------------------------

def _pad2(a, rows, cols):
    return jnp.zeros((rows, cols), jnp.float32).at[:a.shape[0], :a.shape[1]].set(a)


def pack_params(params):
    """Lane-pad all weights to 128 and fuse W_rel/W_root into one stacked matrix.

    Called once (hoisted out of the per-forward path).
    """
    packed = []
    for name in ("conv1", "conv2", "conv3"):
        w_rel, w_root, b = params[name]
        c_in, c_out = w_rel.shape
        assert c_in <= LANE and c_out <= LANE
        wc = jnp.zeros((2 * LANE, LANE), jnp.float32)
        wc = wc.at[:c_in, :c_out].set(w_rel)                # multiplies the (A @ h) slot
        wc = wc.at[LANE:LANE + c_in, :c_out].set(w_root)    # multiplies the h slot
        packed += [wc, _pad2(b.reshape(1, -1), 1, LANE)]
    for name in ("lin1", "lin2", "lin"):
        w, b = params[name]
        assert w.shape[0] <= LANE and w.shape[1] <= LANE
        packed += [_pad2(w, LANE, LANE), _pad2(b.reshape(1, -1), 1, LANE)]
    return packed


def build_graph_operators(edge_index, batch, num_nodes, num_graphs):
    """Dense mean-aggregation adjacency + normalized pooling matrix, sublane-padded.

    Depend only on (edge_index, batch): build once, reuse every forward.
    Padded node rows/cols are zero, padded graph rows are zero.
    """
    n_pad = _round_up(num_nodes, SUBLANE)
    g_pad = _round_up(num_graphs, SUBLANE)

    src, dst = edge_index[0], edge_index[1]
    adj = jnp.zeros((n_pad, n_pad), jnp.float32).at[dst, src].add(1.0)
    deg = adj.sum(axis=1, keepdims=True)
    adj = adj / jnp.maximum(deg, 1.0)

    pool = (batch[None, :] == jnp.arange(g_pad)[:, None]).astype(jnp.float32)  # (Gp, N)
    pool = pool / jnp.maximum(pool.sum(axis=1, keepdims=True), 1.0)
    pool = _pad2(pool, g_pad, n_pad)                                            # (Gp, Np)
    return adj, pool


@partial(jax.jit, static_argnames=("num_graphs", "out_channels"))
def model_forward(packed_params, adj, pool, x, num_graphs, out_channels):
    n, c_in = x.shape
    n_pad = adj.shape[0]
    g_pad = pool.shape[0]
    x_pad = jnp.zeros((n_pad, LANE), jnp.float32).at[:n, :c_in].set(x)

    n_in = 3 + len(packed_params)
    out_pad = pl.pallas_call(
        _fused_forward_kernel,
        out_shape=jax.ShapeDtypeStruct((g_pad, LANE), jnp.float32),
        in_specs=[pl.BlockSpec(memory_space=pltpu.MemorySpace.VMEM)] * n_in,
        out_specs=pl.BlockSpec(memory_space=pltpu.MemorySpace.VMEM),
    )(adj, pool, x_pad, *packed_params)
    return out_pad[:num_graphs, :out_channels]


# ------------------------------ parameter init -------------------------------

def init_params(key, in_channels, hidden_channels, out_channels):
    """Deterministic PyTorch-style uniform(-1/sqrt(fan_in), 1/sqrt(fan_in)) init."""
    params = {}

    def lin_init(k, c_in, c_out, bias=True):
        k1, k2 = jax.random.split(k)
        bound = 1.0 / jnp.sqrt(jnp.float32(c_in))
        w = jax.random.uniform(k1, (c_in, c_out), jnp.float32, -bound, bound)
        b = (jax.random.uniform(k2, (c_out,), jnp.float32, -bound, bound)
             if bias else jnp.zeros((c_out,), jnp.float32))
        return w, b

    keys = jax.random.split(key, 6)
    for name, k, c_in in (("conv1", keys[0], in_channels),
                          ("conv2", keys[1], hidden_channels),
                          ("conv3", keys[2], hidden_channels)):
        kr, ko = jax.random.split(k)
        w_rel, b_rel = lin_init(kr, c_in, hidden_channels, bias=True)
        w_root, _ = lin_init(ko, c_in, hidden_channels, bias=False)
        params[name] = (w_rel, w_root, b_rel)
    params["lin1"] = lin_init(keys[3], hidden_channels, hidden_channels)
    params["lin2"] = lin_init(keys[4], hidden_channels, hidden_channels)
    params["lin"] = lin_init(keys[5], hidden_channels, out_channels)
    return params


# ---------------------------------- driver -----------------------------------

if __name__ == "__main__":
    in_channels, hidden_channels, out_channels = 8, 32, 4
    num_nodes, num_edges, num_graphs = 16, 40, 2

    key = jax.random.PRNGKey(0)
    k_param, k_x, k_e = jax.random.split(key, 3)

    params = init_params(k_param, in_channels, hidden_channels, out_channels)
    packed = pack_params(params)                       # hoisted: built once

    x = jax.random.normal(k_x, (num_nodes, in_channels), jnp.float32)
    edge_index = jax.random.randint(k_e, (2, num_edges), 0, num_nodes, jnp.int32)
    # first half of nodes -> graph 0, second half -> graph 1
    batch = jnp.concatenate([jnp.zeros((num_nodes // 2,), jnp.int32),
                             jnp.ones((num_nodes - num_nodes // 2,), jnp.int32)])

    adj, pool = build_graph_operators(edge_index, batch, num_nodes, num_graphs)  # hoisted

    out = model_forward(packed, adj, pool, x, num_graphs, out_channels)
    jax.block_until_ready(out)
    assert out.shape == (num_graphs, out_channels)
    print("KERNEL_OK")
</pallas_src>

<mosaic_0001>
module attributes {stable_mosaic.version = 11 : i64} {
  func.func @_fused_forward_kernel(%arg0: memref<16x16xf32, #tpu.memory_space<vmem>>, %arg1: memref<8x16xf32, #tpu.memory_space<vmem>>, %arg2: memref<16x128xf32, #tpu.memory_space<vmem>>, %arg3: memref<256x128xf32, #tpu.memory_space<vmem>>, %arg4: memref<1x128xf32, #tpu.memory_space<vmem>>, %arg5: memref<256x128xf32, #tpu.memory_space<vmem>>, %arg6: memref<1x128xf32, #tpu.memory_space<vmem>>, %arg7: memref<256x128xf32, #tpu.memory_space<vmem>>, %arg8: memref<1x128xf32, #tpu.memory_space<vmem>>, %arg9: memref<128x128xf32, #tpu.memory_space<vmem>>, %arg10: memref<1x128xf32, #tpu.memory_space<vmem>>, %arg11: memref<128x128xf32, #tpu.memory_space<vmem>>, %arg12: memref<1x128xf32, #tpu.memory_space<vmem>>, %arg13: memref<128x128xf32, #tpu.memory_space<vmem>>, %arg14: memref<1x128xf32, #tpu.memory_space<vmem>>, %arg15: memref<8x128xf32, #tpu.memory_space<vmem>>) attributes {dimension_semantics = [], scalar_prefetch = 0 : i64, scratch_operands = 0 : i64, tpu.core_type = #tpu.core_type<tc>} {
    %c0 = arith.constant 0 : index
    %c0_0 = arith.constant 0 : index
    %0 = vector.load %arg0[%c0, %c0_0] : memref<16x16xf32, #tpu.memory_space<vmem>>, vector<16x16xf32>
    %c0_1 = arith.constant 0 : index
    %c0_2 = arith.constant 0 : index
    %1 = vector.load %arg2[%c0_1, %c0_2] : memref<16x128xf32, #tpu.memory_space<vmem>>, vector<16x128xf32>
    %cst = arith.constant dense<0.000000e+00> : vector<16x128xf32>
    %2 = tpu.matmul %0, %1, %cst {dimension_numbers = #tpu.dot_dimension_numbers<[1], [0], [0], [1], [0, 0, 1, 1], [], []>} : vector<16x16xf32>, vector<16x128xf32>, vector<16x128xf32> -> vector<16x128xf32>
    %3 = tpu.concatenate %2, %1 in 1 : vector<16x128xf32>, vector<16x128xf32> -> vector<16x256xf32>
    %c0_3 = arith.constant 0 : index
    %c0_4 = arith.constant 0 : index
    %4 = vector.load %arg3[%c0_3, %c0_4] : memref<256x128xf32, #tpu.memory_space<vmem>>, vector<256x128xf32>
    %cst_5 = arith.constant dense<0.000000e+00> : vector<16x128xf32>
    %5 = tpu.matmul %3, %4, %cst_5 {dimension_numbers = #tpu.dot_dimension_numbers<[1], [0], [0], [1], [0, 0, 1, 1], [], []>} : vector<16x256xf32>, vector<256x128xf32>, vector<16x128xf32> -> vector<16x128xf32>
    %c0_6 = arith.constant 0 : index
    %c0_7 = arith.constant 0 : index
    %6 = vector.load %arg4[%c0_6, %c0_7] : memref<1x128xf32, #tpu.memory_space<vmem>>, vector<1x128xf32>
    %7 = vector.broadcast %6 : vector<1x128xf32> to vector<16x128xf32>
    %8 = arith.addf %5, %7 : vector<16x128xf32>
    %cst_8 = arith.constant 0.000000e+00 : f32
    %9 = vector.broadcast %cst_8 : f32 to vector<16x128xf32>
    %10 = arith.maximumf %8, %9 : vector<16x128xf32>
    %cst_9 = arith.constant dense<0.000000e+00> : vector<16x128xf32>
    %11 = tpu.matmul %0, %10, %cst_9 {dimension_numbers = #tpu.dot_dimension_numbers<[1], [0], [0], [1], [0, 0, 1, 1], [], []>} : vector<16x16xf32>, vector<16x128xf32>, vector<16x128xf32> -> vector<16x128xf32>
    %12 = tpu.concatenate %11, %10 in 1 : vector<16x128xf32>, vector<16x128xf32> -> vector<16x256xf32>
    %c0_10 = arith.constant 0 : index
    %c0_11 = arith.constant 0 : index
    %13 = vector.load %arg5[%c0_10, %c0_11] : memref<256x128xf32, #tpu.memory_space<vmem>>, vector<256x128xf32>
    %cst_12 = arith.constant dense<0.000000e+00> : vector<16x128xf32>
    %14 = tpu.matmul %12, %13, %cst_12 {dimension_numbers = #tpu.dot_dimension_numbers<[1], [0], [0], [1], [0, 0, 1, 1], [], []>} : vector<16x256xf32>, vector<256x128xf32>, vector<16x128xf32> -> vector<16x128xf32>
    %c0_13 = arith.constant 0 : index
    %c0_14 = arith.constant 0 : index
    %15 = vector.load %arg6[%c0_13, %c0_14] : memref<1x128xf32, #tpu.memory_space<vmem>>, vector<1x128xf32>
    %16 = vector.broadcast %15 : vector<1x128xf32> to vector<16x128xf32>
    %17 = arith.addf %14, %16 : vector<16x128xf32>
    %cst_15 = arith.constant 0.000000e+00 : f32
    %18 = vector.broadcast %cst_15 : f32 to vector<16x128xf32>
    %19 = arith.maximumf %17, %18 : vector<16x128xf32>
    %cst_16 = arith.constant dense<0.000000e+00> : vector<16x128xf32>
    %20 = tpu.matmul %0, %19, %cst_16 {dimension_numbers = #tpu.dot_dimension_numbers<[1], [0], [0], [1], [0, 0, 1, 1], [], []>} : vector<16x16xf32>, vector<16x128xf32>, vector<16x128xf32> -> vector<16x128xf32>
    %21 = tpu.concatenate %20, %19 in 1 : vector<16x128xf32>, vector<16x128xf32> -> vector<16x256xf32>
    %c0_17 = arith.constant 0 : index
    %c0_18 = arith.constant 0 : index
    %22 = vector.load %arg7[%c0_17, %c0_18] : memref<256x128xf32, #tpu.memory_space<vmem>>, vector<256x128xf32>
    %cst_19 = arith.constant dense<0.000000e+00> : vector<16x128xf32>
    %23 = tpu.matmul %21, %22, %cst_19 {dimension_numbers = #tpu.dot_dimension_numbers<[1], [0], [0], [1], [0, 0, 1, 1], [], []>} : vector<16x256xf32>, vector<256x128xf32>, vector<16x128xf32> -> vector<16x128xf32>
    %c0_20 = arith.constant 0 : index
    %c0_21 = arith.constant 0 : index
    %24 = vector.load %arg8[%c0_20, %c0_21] : memref<1x128xf32, #tpu.memory_space<vmem>>, vector<1x128xf32>
    %25 = vector.broadcast %24 : vector<1x128xf32> to vector<16x128xf32>
    %26 = arith.addf %23, %25 : vector<16x128xf32>
    %c0_22 = arith.constant 0 : index
    %c0_23 = arith.constant 0 : index
    %27 = vector.load %arg1[%c0_22, %c0_23] : memref<8x16xf32, #tpu.memory_space<vmem>>, vector<8x16xf32>
    %cst_24 = arith.constant dense<0.000000e+00> : vector<8x128xf32>
    %28 = tpu.matmul %27, %26, %cst_24 {dimension_numbers = #tpu.dot_dimension_numbers<[1], [0], [0], [1], [0, 0, 1, 1], [], []>} : vector<8x16xf32>, vector<16x128xf32>, vector<8x128xf32> -> vector<8x128xf32>
    %c0_25 = arith.constant 0 : index
    %c0_26 = arith.constant 0 : index
    %29 = vector.load %arg9[%c0_25, %c0_26] : memref<128x128xf32, #tpu.memory_space<vmem>>, vector<128x128xf32>
    %cst_27 = arith.constant dense<0.000000e+00> : vector<8x128xf32>
    %30 = tpu.matmul %28, %29, %cst_27 {dimension_numbers = #tpu.dot_dimension_numbers<[1], [0], [0], [1], [0, 0, 1, 1], [], []>} : vector<8x128xf32>, vector<128x128xf32>, vector<8x128xf32> -> vector<8x128xf32>
    %c0_28 = arith.constant 0 : index
    %c0_29 = arith.constant 0 : index
    %31 = vector.load %arg10[%c0_28, %c0_29] : memref<1x128xf32, #tpu.memory_space<vmem>>, vector<1x128xf32>
    %32 = vector.broadcast %31 : vector<1x128xf32> to vector<8x128xf32>
    %33 = arith.addf %30, %32 : vector<8x128xf32>
    %cst_30 = arith.constant 0.000000e+00 : f32
    %34 = vector.broadcast %cst_30 : f32 to vector<8x128xf32>
    %35 = arith.maximumf %33, %34 : vector<8x128xf32>
    %c0_31 = arith.constant 0 : index
    %c0_32 = arith.constant 0 : index
    %36 = vector.load %arg11[%c0_31, %c0_32] : memref<128x128xf32, #tpu.memory_space<vmem>>, vector<128x128xf32>
    %cst_33 = arith.constant dense<0.000000e+00> : vector<8x128xf32>
    %37 = tpu.matmul %35, %36, %cst_33 {dimension_numbers = #tpu.dot_dimension_numbers<[1], [0], [0], [1], [0, 0, 1, 1], [], []>} : vector<8x128xf32>, vector<128x128xf32>, vector<8x128xf32> -> vector<8x128xf32>
    %c0_34 = arith.constant 0 : index
    %c0_35 = arith.constant 0 : index
    %38 = vector.load %arg12[%c0_34, %c0_35] : memref<1x128xf32, #tpu.memory_space<vmem>>, vector<1x128xf32>
    %39 = vector.broadcast %38 : vector<1x128xf32> to vector<8x128xf32>
    %40 = arith.addf %37, %39 : vector<8x128xf32>
    %cst_36 = arith.constant 0.000000e+00 : f32
    %41 = vector.broadcast %cst_36 : f32 to vector<8x128xf32>
    %42 = arith.maximumf %40, %41 : vector<8x128xf32>
    %c0_37 = arith.constant 0 : index
    %c0_38 = arith.constant 0 : index
    %43 = vector.load %arg13[%c0_37, %c0_38] : memref<128x128xf32, #tpu.memory_space<vmem>>, vector<128x128xf32>
    %cst_39 = arith.constant dense<0.000000e+00> : vector<8x128xf32>
    %44 = tpu.matmul %42, %43, %cst_39 {dimension_numbers = #tpu.dot_dimension_numbers<[1], [0], [0], [1], [0, 0, 1, 1], [], []>} : vector<8x128xf32>, vector<128x128xf32>, vector<8x128xf32> -> vector<8x128xf32>
    %c0_40 = arith.constant 0 : index
    %c0_41 = arith.constant 0 : index
    %45 = vector.load %arg14[%c0_40, %c0_41] : memref<1x128xf32, #tpu.memory_space<vmem>>, vector<1x128xf32>
    %46 = vector.broadcast %45 : vector<1x128xf32> to vector<8x128xf32>
    %47 = arith.addf %44, %46 : vector<8x128xf32>
    %c0_42 = arith.constant 0 : index
    %c0_43 = arith.constant 0 : index
    %48 = vector.load %arg15[%c0_42, %c0_43] : memref<8x128xf32, #tpu.memory_space<vmem>>, vector<8x128xf32>
    tpu.vector_store %arg15[%c0_42, %c0_43], %47 {strides = array<i32>} : memref<8x128xf32, #tpu.memory_space<vmem>>, vector<8x128xf32>,
    return
  }
}

</mosaic_0001>

<bundles_post_ra>
// kernel: model_forward.1
= control target key start
LH: loop header
LB: loop body
LE: loop exit
PB: predicated region body
PF: predicated region fallthrough
CT: control target
= control target key end

     0   :  { %20 = vsyncpa [#allocation3], 0  ;;  %s997_s0 = inlined_call_operand.vmem [shape: f32[16,16], index: 0, kind: input, shape index: {}]   ;;  %s998_s1 = inlined_call_operand.vmem [shape: f32[8,16], index: 1, kind: input, shape index: {}]   ;;  %s999_s2 = inlined_call_operand.vmem [shape: f32[16,128], index: 2, kind: input, shape index: {}]   ;;  %s1000_s3 = inlined_call_operand.hbm [shape: f32[256,128], index: 3, kind: input, shape index: {}]   ;;  %s1001_s4 = inlined_call_operand.vmem [shape: f32[1,128], index: 4, kind: input, shape index: {}]   ;;  %s1002_s5 = inlined_call_operand.hbm [shape: f32[256,128], index: 5, kind: input, shape index: {}]   ;;  %s1003_s6 = inlined_call_operand.vmem [shape: f32[1,128], index: 6, kind: input, shape index: {}]   ;;  %s1004_s7 = inlined_call_operand.hbm [shape: f32[256,128], index: 7, kind: input, shape index: {}]   ;;  %s1005_s8 = inlined_call_operand.vmem [shape: f32[1,128], index: 8, kind: input, shape index: {}]   ;;  %s1006_s9 = inlined_call_operand.hbm [shape: f32[128,128], index: 9, kind: input, shape index: {}]   ;;  %s1007_s10 = inlined_call_operand.vmem [shape: f32[1,128], index: 10, kind: input, shape index: {}]   ;;  %s1008_s11 = inlined_call_operand.hbm [shape: f32[128,128], index: 11, kind: input, shape index: {}]   ;;  %s1009_s12 = inlined_call_operand.vmem [shape: f32[1,128], index: 12, kind: input, shape index: {}]   ;;  %s1010_s13 = inlined_call_operand.hbm [shape: f32[128,128], index: 13, kind: input, shape index: {}]   ;;  %s1011_s14 = inlined_call_operand.vmem [shape: f32[1,128], index: 14, kind: input, shape index: {}]   ;;  %s1012_s15 = inlined_call_operand.vmem [shape: f32[8,128], index: 15, kind: output, shape index: {}]  }
   0x1   :  { %21 = vsyncpa [#allocation5], 0 }
   0x2   :  { %22 = vsyncpa [#allocation8], 0 }
   0x3   :  { %23 = vsyncpa [#allocation11], 0  ;;  %s49_s20 = sshll.u32 %s1002_s5, 4  ;;  %s802_s21 = smov [#allocation4]   ;;  %s50_s20 = int_to_ptr.hbm [resolvable:$true] %s49_s20 }
   0x4   :  { %s51_s22 = sshll.u32 %s802_s21, 4  ;;  %s79_s25 = sshll.u32 %s1006_s9, 4  ;;  %s52_s22 = int_to_ptr.vmem [resolvable:$true] %s51_s22  ;;  %s80_s25 = int_to_ptr.hbm [resolvable:$true] %s79_s25 }
   0x5   :  { %s803_s26 = smov 128   ;;  %s804_s27 = smov 8  }
   0x6   :  { %57 = dma.hbm_to_vmem [thread:$0]  %s50_s20, 4096, %s52_s22, [#allocation5], %s803_s26, %s803_s26, %s804_s27  }
   0x7   :  { %s805_s28 = smov [#allocation7]   ;;  %s34_s5 = sshll.u32 %s1000_s3, 4  ;;  %s35_s5 = int_to_ptr.hbm [resolvable:$true] %s34_s5 }
   0x8   :  { %s81_s29 = sshll.u32 %s805_s28, 4  ;;  %s64_s18 = sshll.u32 %s1004_s7, 4  ;;  %s82_s29 = int_to_ptr.vmem [resolvable:$true] %s81_s29  ;;  %s65_s18 = int_to_ptr.hbm [resolvable:$true] %s64_s18 }
   0x9   :  { %87 = dma.hbm_to_vmem [thread:$0]  %s80_s25, 2048, %s82_s29, [#allocation8], %s803_s26, %s803_s26, %s804_s27  }
   0xa   :  { %s806_s19 = smov [#allocation2]   ;;  %s807_s20 = smov [#allocation6]  }
   0xb   :  { %s36_s21 = sshll.u32 %s806_s19, 4  ;;  %s66_s3 = sshll.u32 %s807_s20, 4  ;;  %s37_s21 = int_to_ptr.vmem [resolvable:$true] %s36_s21  ;;  %s67_s3 = int_to_ptr.vmem [resolvable:$true] %s66_s3 }
   0xc   :  { %42 = dma.hbm_to_vmem [thread:$0]  %s35_s5, 4096, %s37_s21, [#allocation3], %s803_s26, %s803_s26, %s804_s27  }
   0xd   :  { %s94_s24 = sshll.u32 %s1008_s11, 4  ;;  %s109_s28 = sshll.u32 %s1010_s13, 4  ;;  %s95_s24 = int_to_ptr.hbm [resolvable:$true] %s94_s24  ;;  %s110_s28 = int_to_ptr.hbm [resolvable:$true] %s109_s28 }
   0xe   :  { %72 = dma.hbm_to_vmem [thread:$0]  %s65_s18, 4096, %s67_s3, [#allocation5], %s803_s26, %s803_s26, %s804_s27  }
   0xf   :  { %s808_s29 = smov [#allocation9]   ;;  %s809_s16 = smov [#allocation10]  }
  0x10   :  { %s96_s30 = sshll.u32 %s808_s29, 4  ;;  %s111_s11 = sshll.u32 %s809_s16, 4  ;;  %s97_s30 = int_to_ptr.vmem [resolvable:$true] %s96_s30  ;;  %s112_s11 = int_to_ptr.vmem [resolvable:$true] %s111_s11 }
  0x11   :  { %102 = dma.hbm_to_vmem [thread:$0]  %s95_s24, 2048, %s97_s30, [#allocation8], %s803_s26, %s803_s26, %s804_s27  }
  0x12   :  { %117 = dma.hbm_to_vmem [thread:$0]  %s110_s28, 2048, %s112_s11, [#allocation11], %s803_s26, %s803_s26, %s804_s27  }
  0x13   :  { %794 = dma.done.wait [#allocation3], 4096  }
  0x14   :  { %795 = vsyncadd [#allocation3], 4294963200 }
  0x15   :  { %796 = dma.done.wait [#allocation5], 8192  }
  0x16   :  { %797 = vsyncadd [#allocation5], 4294959104 }
  0x17   :  { %798 = dma.done.wait [#allocation8], 4096  }
  0x18   :  { %799 = vsyncadd [#allocation8], 4294963200 }
  0x19   :  { %800 = dma.done.wait [#allocation11], 2048  }
  0x1a   :  { %801 = vsyncadd [#allocation11], 4294965248  ;;  %v929_v0 = vld [vmem:[%s999_s2 + $0x8] sm:$0xff]  ;;  %v934_v1 = vld [vmem:[%s999_s2] sm:$0xff]  ;;  %vm148_vm0 = vcmask 130048  }
  0x1b   :  { %169 = vmatpush.msra.mxu0 %v929_v0  ;;  %v940_v2 = vld [vmem:[%s997_s0] sm:$0xff]  ;;  %v209_v3 = vld [vmem:[#allocation2 + $0xf8] sm:$0xff]  ;;  %v208_v4 = vld [vmem:[#allocation2 + $0xf0] sm:$0xff] }
  0x1c   :  { %237 = vmatpush.msra.mxu2 %v209_v3  ;;  %v193_v5 = vld [vmem:[#allocation2 + $0x78] sm:$0xff]  ;;  %v192_v6 = vld [vmem:[#allocation2 + $0x70] sm:$0xff]  ;;  %v207_v7 = vld [vmem:[#allocation2 + $0xe8] sm:$0xff] }
  0x1d   :  { %170 = vmatpush.msra.mxu0 %v934_v1  ;;  %214 = vmatpush.msra.mxu1 %v193_v5  ;;  %v191_v8 = vld [vmem:[#allocation2 + $0x68] sm:$0xff]  ;;  %v206_v9 = vld [vmem:[#allocation2 + $0xe0] sm:$0xff]  ;;  %v205_v11 = vld [vmem:[#allocation2 + $0xd8] sm:$0xff] }
  0x1e   :  { %629 = vmatmul.msk.f32.vlgmr.msra.gmra.mxu0 %vm148_vm0, %v940_v2  ;;  %238 = vmatpush.msra.mxu2 %v208_v4  ;;  %v190_v10 = vld [vmem:[#allocation2 + $0x60] sm:$0xff]  ;;  %v189_v12 = vld [vmem:[#allocation2 + $0x58] sm:$0xff]  ;;  %v948_v13 = vld [vmem:[%s997_s0 + $0x8] sm:$0xff] }
  0x1f   :  { %215 = vmatpush.msra.mxu1 %v192_v6  ;;  %v204_v14 = vld [vmem:[#allocation2 + $0xd0] sm:$0xff]  ;;  %v203_v16 = vld [vmem:[#allocation2 + $0xc8] sm:$0xff]  ;;  %v202_v18 = vld [vmem:[#allocation2 + $0xc0] sm:$0xff] }
  0x20   :  { %239 = vmatpush.msra.mxu2 %v207_v7  ;;  %v188_v15 = vld [vmem:[#allocation2 + $0x50] sm:$0xff]  ;;  %v187_v17 = vld [vmem:[#allocation2 + $0x48] sm:$0xff]  ;;  %v186_v19 = vld [vmem:[#allocation2 + $0x40] sm:$0xff] }
  0x21   :  { %216 = vmatpush.msra.mxu1 %v191_v8  ;;  %v201_v20 = vld [vmem:[#allocation2 + $0xb8] sm:$0xff]  ;;  %v200_v22 = vld [vmem:[#allocation2 + $0xb0] sm:$0xff]  ;;  %v199_v24 = vld [vmem:[#allocation2 + $0xa8] sm:$0xff] }
  0x22   :  { %240 = vmatpush.msra.mxu2 %v206_v9  ;;  %v185_v21 = vld [vmem:[#allocation2 + $0x38] sm:$0xff]  ;;  %v184_v23 = vld [vmem:[#allocation2 + $0x30] sm:$0xff]  ;;  %v183_v25 = vld [vmem:[#allocation2 + $0x28] sm:$0xff] }
  0x23   :  { %217 = vmatpush.msra.mxu1 %v190_v10  ;;  %v198_v26 = vld [vmem:[#allocation2 + $0xa0] sm:$0xff]  ;;  %v197_v28 = vld [vmem:[#allocation2 + $0x98] sm:$0xff]  ;;  %v196_v30 = vld [vmem:[#allocation2 + $0x90] sm:$0xff] }
  0x24   :  { %241 = vmatpush.msra.mxu2 %v205_v11  ;;  %v182_v27 = vld [vmem:[#allocation2 + $0x20] sm:$0xff]  ;;  %v181_v29 = vld [vmem:[#allocation2 + $0x18] sm:$0xff]  ;;  %v180_v31 = vld [vmem:[#allocation2 + $0x10] sm:$0xff] }
  0x25   :  { %218 = vmatpush.msra.mxu1 %v189_v12  ;;  %v195_v32 = vld [vmem:[#allocation2 + $0x88] sm:$0xff]  ;;  %v194_v34 = vld [vmem:[#allocation2 + $0x80] sm:$0xff]  ;;  %v316_v49 = vld [vmem:[#allocation4 + $0xf8] sm:$0xff] }
  0x26   :  { %630 = vmatmul.msk.f32.gmra.mxu0 %vm148_vm0, %v948_v13  ;;  %242 = vmatpush.msra.mxu2 %v204_v14  ;;  %v179_v33 = vld [vmem:[#allocation2 + $0x8] sm:$0xff]  ;;  %v178_v35 = vld [vmem:[#allocation2] sm:$0xff]  ;;  %v315_v50 = vld [vmem:[#allocation4 + $0xf0] sm:$0xff] }
  0x27   :  { %219 = vmatpush.msra.mxu1 %v188_v15  ;;  %v644_v40 = vld [vmem:[%s1001_s4] ss:$0 sm:$0xff]  ;;  %v314_v51 = vld [vmem:[#allocation4 + $0xe8] sm:$0xff]  ;;  %v312_v53 = vld [vmem:[#allocation4 + $0xd8] sm:$0xff] }
  0x28   :  { %243 = vmatpush.msra.mxu2 %v203_v16  ;;  %v313_v52 = vld [vmem:[#allocation4 + $0xe0] sm:$0xff]  ;;  %v311_v54 = vld [vmem:[#allocation4 + $0xd0] sm:$0xff]  ;;  %v300_v55 = vld [vmem:[#allocation4 + $0x78] sm:$0xff] }
  0x29   :  { %220 = vmatpush.msra.mxu1 %v187_v17  ;;  %v299_v56 = vld [vmem:[#allocation4 + $0x70] sm:$0xff]  ;;  %321 = vmatpush.msrb.mxu0 %v300_v55  ;;  %v310_v57 = vld [vmem:[#allocation4 + $0xc8] sm:$0xff]  ;;  %v309_v59 = vld [vmem:[#allocation4 + $0xc0] sm:$0xff] }
  0x2a   :  { %244 = vmatpush.msra.mxu2 %v202_v18  ;;  %v298_v58 = vld [vmem:[#allocation4 + $0x68] sm:$0xff]  ;;  %v297_v60 = vld [vmem:[#allocation4 + $0x60] sm:$0xff]  ;;  %v308_v61 = vld [vmem:[#allocation4 + $0xb8] sm:$0xff] }
  0x2b   :  { %221 = vmatpush.msra.mxu1 %v186_v19  ;;  %322 = vmatpush.msrb.mxu0 %v299_v56  ;;  %v296_v62 = vld [vmem:[#allocation4 + $0x58] sm:$0xff]  ;;  %v307_v63 = vld [vmem:[#allocation4 + $0xb0] sm:$0xff]  ;;  %v294_v3 = vld [vmem:[#allocation4 + $0x48] sm:$0xff] }
  0x2c   :  { %245 = vmatpush.msra.mxu2 %v201_v20  ;;  %v305_v4 = vld [vmem:[#allocation4 + $0xa0] sm:$0xff]  ;;  %v304_v6 = vld [vmem:[#allocation4 + $0x98] sm:$0xff]  ;;  %v303_v8 = vld [vmem:[#allocation4 + $0x90] sm:$0xff] }
  0x2d   :  { %222 = vmatpush.msra.mxu1 %v185_v21  ;;  %323 = vmatpush.msrb.mxu0 %v298_v58  ;;  %v293_v5 = vld [vmem:[#allocation4 + $0x40] sm:$0xff]  ;;  %v292_v7 = vld [vmem:[#allocation4 + $0x38] sm:$0xff]  ;;  %v291_v9 = vld [vmem:[#allocation4 + $0x30] sm:$0xff] }
  0x2e   :  { %246 = vmatpush.msra.mxu2 %v200_v22  ;;  %v302_v10 = vld [vmem:[#allocation4 + $0x88] sm:$0xff]  ;;  %v301_v12 = vld [vmem:[#allocation4 + $0x80] sm:$0xff]  ;;  %v288_v15 = vld [vmem:[#allocation4 + $0x18] sm:$0xff] }
  0x2f   :  { %223 = vmatpush.msra.mxu1 %v184_v23  ;;  %324 = vmatpush.msrb.mxu0 %v297_v60  ;;  %v290_v11 = vld [vmem:[#allocation4 + $0x28] sm:$0xff]  ;;  %v289_v14 = vld [vmem:[#allocation4 + $0x20] sm:$0xff]  ;;  %v287_v16 = vld [vmem:[#allocation4 + $0x10] sm:$0xff] }
  0x30   :  { %247 = vmatpush.msra.mxu2 %v199_v24  ;;  %v286_v17 = vld [vmem:[#allocation4 + $0x8] sm:$0xff]  ;;  %v285_v18 = vld [vmem:[#allocation4] sm:$0xff]  ;;  %v423_v21 = vld [vmem:[#allocation6 + $0xf8] sm:$0xff] }
  0x31   :  { %224 = vmatpush.msra.mxu1 %v183_v25  ;;  %325 = vmatpush.msrb.mxu0 %v296_v62  ;;  %v422_v22 = vld [vmem:[#allocation6 + $0xf0] sm:$0xff]  ;;  %v421_v23 = vld [vmem:[#allocation6 + $0xe8] sm:$0xff]  ;;  %v420_v24 = vld [vmem:[#allocation6 + $0xe0] sm:$0xff] }
  0x32   :  { %248 = vmatpush.msra.mxu2 %v198_v26  ;;  %v419_v25 = vld [vmem:[#allocation6 + $0xd8] sm:$0xff]  ;;  %v418_v26 = vld [vmem:[#allocation6 + $0xd0] sm:$0xff]  ;;  %v397_v58 = vld [vmem:[#allocation6 + $0x28] sm:$0xff] }
  0x33   :  { %225 = vmatpush.msra.mxu1 %v182_v27  ;;  %v417_v27 = vld [vmem:[#allocation6 + $0xc8] sm:$0xff]  ;;  %v398_v55 = vld [vmem:[#allocation6 + $0x30] sm:$0xff]  ;;  %v395_v60 = vld [vmem:[#allocation6 + $0x18] sm:$0xff] }
  0x34   :  { %249 = vmatpush.msra.mxu2 %v197_v28  ;;  %v416_v28 = vld [vmem:[#allocation6 + $0xc0] sm:$0xff]  ;;  %v393_v62 = vld [vmem:[#allocation6 + $0x8] sm:$0xff] }
  0x35   :  { %226 = vmatpush.msra.mxu1 %v181_v29  ;;  %v415_v29 = vld [vmem:[#allocation6 + $0xb8] sm:$0xff] }
  0x36   :  { %250 = vmatpush.msra.mxu2 %v196_v30  ;;  %v414_v30 = vld [vmem:[#allocation6 + $0xb0] sm:$0xff] }
  0x37   :  { %227 = vmatpush.msra.mxu1 %v180_v31  ;;  %v413_v31 = vld [vmem:[#allocation6 + $0xa8] sm:$0xff] }
  0x38   :  { %251 = vmatpush.msra.mxu2 %v195_v32  ;;  %v412_v32 = vld [vmem:[#allocation6 + $0xa0] sm:$0xff] }
  0x39   :  { %228 = vmatpush.msra.mxu1 %v179_v33  ;;  %v411_v33 = vld [vmem:[#allocation6 + $0x98] sm:$0xff] }
  0x3a   :  { %252 = vmatpush.msra.mxu2 %v194_v34  ;;  %v410_v34 = vld [vmem:[#allocation6 + $0x90] sm:$0xff] }
  0x3b   :  { %253 = vmatmul.f32.vlgmr.msra.gmra.mxu2 %v934_v1  ;;  %229 = vmatpush.msra.mxu1 %v178_v35  ;;  %v306_v1 = vld [vmem:[#allocation4 + $0xa8] sm:$0xff] }
  0x3c   :  { %v409_v35 = vld [vmem:[#allocation6 + $0x88] sm:$0xff] }
  0x43   :  { %256 = vmatmul.f32.gmra.mxu2 %v929_v0  ;;  %v295_v0 = vld [vmem:[#allocation4 + $0x50] sm:$0xff] }
  0x44   :  { %326 = vmatpush.msrb.mxu0 %v295_v0 }
  0x46   :  { %327 = vmatpush.msrb.mxu0 %v294_v3  ;;  %v512_v3 = vld [vmem:[#allocation7 + $0x70] sm:$0xff] }
  0x48   :  { %328 = vmatpush.msrb.mxu0 %v293_v5  ;;  %v509_v5 = vld [vmem:[#allocation7 + $0x58] sm:$0xff] }
  0x4a   :  { %329 = vmatpush.msrb.mxu0 %v292_v7  ;;  %v507_v7 = vld [vmem:[#allocation7 + $0x48] sm:$0xff] }
  0x4c   :  { %330 = vmatpush.msrb.mxu0 %v291_v9  ;;  %v505_v9 = vld [vmem:[#allocation7 + $0x38] sm:$0xff] }
  0x4e   :  { %331 = vmatpush.msrb.mxu0 %v290_v11 }
  0x50   :  { %332 = vmatpush.msrb.mxu0 %v289_v14  ;;  %v503_v14 = vld [vmem:[#allocation7 + $0x28] sm:$0xff] }
  0x52   :  { %333 = vmatpush.msrb.mxu0 %v288_v15  ;;  %v502_v15 = vld [vmem:[#allocation7 + $0x20] sm:$0xff] }
  0x54   :  { %334 = vmatpush.msrb.mxu0 %v287_v16  ;;  %v646_v16 = vld [vmem:[%s1005_s8] ss:$0 sm:$0xff] }
  0x56   :  { %335 = vmatpush.msrb.mxu0 %v286_v17  ;;  %v501_v17 = vld [vmem:[#allocation7 + $0x18] sm:$0xff] }
  0x58   :  { %336 = vmatpush.msrb.mxu0 %v285_v18 }
  0x5a   :  { %451 = vmatpush.msra.mxu0 %v423_v21 }
  0x5c   :  { %452 = vmatpush.msra.mxu0 %v422_v22 }
  0x5e   :  { %453 = vmatpush.msra.mxu0 %v421_v23  ;;  %v499_v23 = vld [vmem:[#allocation7 + $0x8] sm:$0xff] }
  0x60   :  { %454 = vmatpush.msra.mxu0 %v420_v24 }
  0x62   :  { %455 = vmatpush.msra.mxu0 %v419_v25 }
  0x64   :  { %456 = vmatpush.msra.mxu0 %v418_v26  ;;  %v474_v26 = vld [vmem:[%s998_s1] sm:$0xff] }
  0x66   :  { %457 = vmatpush.msra.mxu0 %v417_v27  ;;  %v498_v27 = vld [vmem:[#allocation7] sm:$0xff] }
  0x68   :  { %458 = vmatpush.msra.mxu0 %v416_v28  ;;  %v554_v28 = vld [vmem:[#allocation9 + $0x78] sm:$0xff] }
  0x6a   :  { %459 = vmatpush.msra.mxu0 %v415_v29  ;;  %v553_v29 = vld [vmem:[#allocation9 + $0x70] sm:$0xff] }
  0x6c   :  { %460 = vmatpush.msra.mxu0 %v414_v30  ;;  %v552_v30 = vld [vmem:[#allocation9 + $0x68] sm:$0xff] }
  0x6e   :  { %461 = vmatpush.msra.mxu0 %v413_v31  ;;  %v551_v31 = vld [vmem:[#allocation9 + $0x60] sm:$0xff] }
  0x70   :  { %462 = vmatpush.msra.mxu0 %v412_v32  ;;  %v550_v32 = vld [vmem:[#allocation9 + $0x58] sm:$0xff] }
  0x72   :  { %463 = vmatpush.msra.mxu0 %v411_v33  ;;  %v549_v33 = vld [vmem:[#allocation9 + $0x50] sm:$0xff] }
  0x74   :  { %464 = vmatpush.msra.mxu0 %v410_v34  ;;  %v548_v34 = vld [vmem:[#allocation9 + $0x48] sm:$0xff] }
  0x76   :  { %465 = vmatpush.msra.mxu0 %v409_v35  ;;  %v547_v35 = vld [vmem:[#allocation9 + $0x40] sm:$0xff] }
  0x9b   :  { %v172_v36 = vpop.f32.mrf.mxu0 }
  0x9c   :  { %230 = vmatmul.f32.vlgmr.msra.gmra.mxu1 %v172_v36  ;;  %v408_v36 = vld [vmem:[#allocation6 + $0x80] sm:$0xff] }
  0x9d   :  { %466 = vmatpush.msra.mxu0 %v408_v36  ;;  %v546_v36 = vld [vmem:[#allocation9 + $0x38] sm:$0xff] }
  0xa3   :  { %v175_v37 = vpop.f32.mrf.mxu0 }
  0xa4   :  { %233 = vmatmul.f32.gmra.mxu1 %v175_v37  ;;  %v407_v37 = vld [vmem:[#allocation6 + $0x78] sm:$0xff] }
  0xa5   :  { %428 = vmatpush.msrb.mxu2 %v407_v37  ;;  %v545_v37 = vld [vmem:[#allocation9 + $0x30] sm:$0xff] }
  0xbe   :  { %v254_v38 = vpop.f32.mrf.mxu2 }
  0xc6   :  { %v257_v43 = vpop.f32.mrf.mxu2 }
 0x119   :  { %v231_v39 = vpop.f32.mrf.mxu1 }
 0x11a   :  { %v232_v41 = vadd.f32 %v644_v40, %v231_v39  ;;  %v405_v39 = vld [vmem:[#allocation6 + $0x68] sm:$0xff] }
 0x11c   :  { %v957_v45 = vadd.f32 %v254_v38, %v232_v41  ;;  %v406_v38 = vld [vmem:[#allocation6 + $0x70] sm:$0xff]  ;;  %v404_v41 = vld [vmem:[#allocation6 + $0x60] sm:$0xff] }
 0x11d   :  { %429 = vmatpush.msrb.mxu2 %v406_v38  ;;  %v544_v38 = vld [vmem:[#allocation9 + $0x28] sm:$0xff] }
 0x11e   :  { %v260_v48 = vmax.f32 %v957_v45, 0.0 }
 0x11f   :  { %430 = vmatpush.msrb.mxu2 %v405_v39  ;;  %v543_v39 = vld [vmem:[#allocation9 + $0x20] sm:$0xff] }
 0x121   :  { %v234_v42 = vpop.f32.mrf.mxu1  ;;  %431 = vmatpush.msrb.mxu2 %v404_v41 }
 0x122   :  { %v235_v44 = vadd.f32 %v644_v40, %v234_v42  ;;  %v645_v40 = vld [vmem:[%s1003_s6] ss:$0 sm:$0xff] }
 0x124   :  { %v959_v46 = vadd.f32 %v257_v43, %v235_v44  ;;  %v403_v44 = vld [vmem:[#allocation6 + $0x58] sm:$0xff] }
 0x125   :  { %432 = vmatpush.msrb.mxu2 %v403_v44  ;;  %v539_v44 = vld [vmem:[#allocation9] sm:$0xff] }
 0x126   :  { %v261_v47 = vmax.f32 %v959_v46, 0.0  ;;  %v402_v46 = vld [vmem:[#allocation6 + $0x50] sm:$0xff] }
 0x127   :  { %433 = vmatpush.msrb.mxu2 %v402_v46  ;;  %v594_v46 = vld [vmem:[#allocation10 + $0x70] sm:$0xff] }
 0x128   :  { %276 = vmatpush.msra.mxu3 %v261_v47 }
 0x12a   :  { %277 = vmatpush.msra.mxu3 %v260_v48 }
 0x12b   :  { %631 = vmatmul.msk.f32.vlgmr.msra.gmra.mxu3 %vm148_vm0, %v940_v2 }
 0x12c   :  { %344 = vmatpush.msrb.mxu3 %v316_v49 }
 0x12e   :  { %345 = vmatpush.msrb.mxu3 %v315_v50  ;;  %v400_v50 = vld [vmem:[#allocation6 + $0x40] sm:$0xff] }
 0x130   :  { %346 = vmatpush.msrb.mxu3 %v314_v51 }
 0x132   :  { %347 = vmatpush.msrb.mxu3 %v313_v52  ;;  %v399_v52 = vld [vmem:[#allocation6 + $0x38] sm:$0xff] }
 0x133   :  { %632 = vmatmul.msk.f32.gmra.mxu3 %vm148_vm0, %v948_v13 }
 0x134   :  { %348 = vmatpush.msrb.mxu3 %v312_v53 }
 0x136   :  { %349 = vmatpush.msrb.mxu3 %v311_v54 }
 0x138   :  { %350 = vmatpush.msrb.mxu3 %v310_v57 }
 0x13a   :  { %351 = vmatpush.msrb.mxu3 %v309_v59  ;;  %v396_v59 = vld [vmem:[#allocation6 + $0x20] sm:$0xff] }
 0x13c   :  { %352 = vmatpush.msrb.mxu3 %v308_v61  ;;  %v394_v61 = vld [vmem:[#allocation6 + $0x10] sm:$0xff] }
 0x13e   :  { %353 = vmatpush.msrb.mxu3 %v307_v63  ;;  %v392_v63 = vld [vmem:[#allocation6] sm:$0xff] }
 0x140   :  { %354 = vmatpush.msrb.mxu3 %v306_v1 }
 0x142   :  { %355 = vmatpush.msrb.mxu3 %v305_v4  ;;  %v510_v4 = vld [vmem:[#allocation7 + $0x60] sm:$0xff] }
 0x144   :  { %356 = vmatpush.msrb.mxu3 %v304_v6  ;;  %v508_v6 = vld [vmem:[#allocation7 + $0x50] sm:$0xff] }
 0x146   :  { %357 = vmatpush.msrb.mxu3 %v303_v8  ;;  %v506_v8 = vld [vmem:[#allocation7 + $0x40] sm:$0xff] }
 0x148   :  { %358 = vmatpush.msrb.mxu3 %v302_v10 }
 0x14a   :  { %359 = vmatpush.msrb.mxu3 %v301_v12  ;;  %v504_v12 = vld [vmem:[#allocation7 + $0x30] sm:$0xff] }
 0x14b   :  { %360 = vmatmul.f32.vlgmr.msrb.gmra.mxu3 %v260_v48  ;;  %v401_v48 = vld [vmem:[#allocation6 + $0x48] sm:$0xff] }
 0x14c   :  { %434 = vmatpush.msrb.mxu2 %v401_v48  ;;  %v592_v48 = vld [vmem:[#allocation10 + $0x60] sm:$0xff] }
 0x14e   :  { %435 = vmatpush.msrb.mxu2 %v400_v50  ;;  %v590_v50 = vld [vmem:[#allocation10 + $0x50] sm:$0xff] }
 0x150   :  { %436 = vmatpush.msrb.mxu2 %v399_v52  ;;  %v588_v52 = vld [vmem:[#allocation10 + $0x40] sm:$0xff] }
 0x152   :  { %437 = vmatpush.msrb.mxu2 %v398_v55  ;;  %v585_v55 = vld [vmem:[#allocation10 + $0x28] sm:$0xff] }
 0x153   :  { %363 = vmatmul.f32.gmra.mxu3 %v261_v47 }
 0x154   :  { %438 = vmatpush.msrb.mxu2 %v397_v58  ;;  %v647_v58 = vld [vmem:[%s1007_s10] ss:$0 sm:$0xff] }
 0x156   :  { %439 = vmatpush.msrb.mxu2 %v396_v59 }
 0x158   :  { %440 = vmatpush.msrb.mxu2 %v395_v60 }
 0x15a   :  { %441 = vmatpush.msrb.mxu2 %v394_v61 }
 0x15c   :  { %442 = vmatpush.msrb.mxu2 %v393_v62  ;;  %v582_v62 = vld [vmem:[#allocation10 + $0x10] sm:$0xff] }
 0x15e   :  { %443 = vmatpush.msrb.mxu2 %v392_v63  ;;  %v581_v63 = vld [vmem:[#allocation10 + $0x8] sm:$0xff] }
 0x1ae   :  { %v279_v19 = vpop.f32.mrf.mxu3 }
 0x1af   :  { %337 = vmatmul.f32.vlgmr.msrb.gmra.mxu0 %v279_v19  ;;  %v500_v19 = vld [vmem:[#allocation7 + $0x10] sm:$0xff] }
 0x1b6   :  { %v282_v20 = vpop.f32.mrf.mxu3 }
 0x1b7   :  { %340 = vmatmul.f32.gmra.mxu0 %v282_v20 }
 0x1ce   :  { %v361_v42 = vpop.f32.mrf.mxu3 }
 0x1d6   :  { %v364_v54 = vpop.f32.mrf.mxu3 }
 0x22c   :  { %v338_v43 = vpop.f32.mrf.mxu0 }
 0x22d   :  { %v339_v45 = vadd.f32 %v645_v40, %v338_v43  ;;  %v540_v43 = vld [vmem:[#allocation9 + $0x8] sm:$0xff] }
 0x22f   :  { %v362_v47 = vadd.f32 %v361_v42, %v339_v45  ;;  %v541_v42 = vld [vmem:[#allocation9 + $0x10] sm:$0xff]  ;;  %v595_v45 = vld [vmem:[#allocation10 + $0x78] sm:$0xff] }
 0x230   :  { %600 = vmatpush.msra.mxu2 %v595_v45 }
 0x231   :  { %v367_v49 = vmax.f32 %v362_v47, 0.0  ;;  %v593_v47 = vld [vmem:[#allocation10 + $0x68] sm:$0xff] }
 0x232   :  { %601 = vmatpush.msra.mxu2 %v594_v46 }
 0x233   :  { %467 = vmatmul.f32.vlgmr.msra.gmra.mxu0 %v367_v49 }
 0x234   :  { %v341_v51 = vpop.f32.mrf.mxu0  ;;  %602 = vmatpush.msra.mxu2 %v593_v47 }
 0x235   :  { %v342_v53 = vadd.f32 %v645_v40, %v341_v51  ;;  %v542_v40 = vld [vmem:[#allocation9 + $0x18] sm:$0xff]  ;;  %v589_v51 = vld [vmem:[#allocation10 + $0x48] sm:$0xff] }
 0x236   :  { %603 = vmatpush.msra.mxu2 %v592_v48 }
 0x237   :  { %v365_v56 = vadd.f32 %v364_v54, %v342_v53  ;;  %v587_v53 = vld [vmem:[#allocation10 + $0x38] sm:$0xff]  ;;  %v586_v54 = vld [vmem:[#allocation10 + $0x30] sm:$0xff] }
 0x239   :  { %v368_v57 = vmax.f32 %v365_v56, 0.0  ;;  %v584_v56 = vld [vmem:[#allocation10 + $0x20] sm:$0xff] }
 0x23b   :  { %383 = vmatpush.msrb.mxu1 %v368_v57  ;;  %470 = vmatmul.f32.gmra.mxu0 %v368_v57  ;;  %v583_v57 = vld [vmem:[#allocation10 + $0x18] sm:$0xff] }
 0x23d   :  { %384 = vmatpush.msrb.mxu1 %v367_v49  ;;  %v591_v49 = vld [vmem:[#allocation10 + $0x58] sm:$0xff] }
 0x23e   :  { %633 = vmatmul.msk.f32.vlgmr.msrb.gmra.mxu1 %vm148_vm0, %v940_v2  ;;  %v513_v2 = vld [vmem:[#allocation7 + $0x78] sm:$0xff]  ;;  %604 = vmatpush.msra.mxu2 %v591_v49 }
 0x23f   :  { %518 = vmatpush.msra.mxu1 %v513_v2 }
 0x240   :  { %605 = vmatpush.msra.mxu2 %v590_v50 }
 0x241   :  { %519 = vmatpush.msra.mxu1 %v512_v3 }
 0x242   :  { %606 = vmatpush.msra.mxu2 %v589_v51 }
 0x244   :  { %607 = vmatpush.msra.mxu2 %v588_v52 }
 0x246   :  { %634 = vmatmul.msk.f32.gmra.mxu1 %vm148_vm0, %v948_v13  ;;  %v511_v13 = vld [vmem:[#allocation7 + $0x68] sm:$0xff]  ;;  %608 = vmatpush.msra.mxu2 %v587_v53 }
 0x247   :  { %520 = vmatpush.msra.mxu1 %v511_v13 }
 0x248   :  { %609 = vmatpush.msra.mxu2 %v586_v54 }
 0x249   :  { %521 = vmatpush.msra.mxu1 %v510_v4  ;;  %v649_v4 = vld [vmem:[%s1011_s14] ss:$0 sm:$0xff] }
 0x24a   :  { %610 = vmatpush.msra.mxu2 %v585_v55 }
 0x24b   :  { %522 = vmatpush.msra.mxu1 %v509_v5 }
 0x24c   :  { %611 = vmatpush.msra.mxu2 %v584_v56 }
 0x24d   :  { %523 = vmatpush.msra.mxu1 %v508_v6 }
 0x24e   :  { %612 = vmatpush.msra.mxu2 %v583_v57 }
 0x24f   :  { %524 = vmatpush.msra.mxu1 %v507_v7 }
 0x250   :  { %613 = vmatpush.msra.mxu2 %v582_v62 }
 0x251   :  { %525 = vmatpush.msra.mxu1 %v506_v8 }
 0x252   :  { %614 = vmatpush.msra.mxu2 %v581_v63 }
 0x253   :  { %526 = vmatpush.msra.mxu1 %v505_v9 }
 0x255   :  { %527 = vmatpush.msra.mxu1 %v504_v12 }
 0x257   :  { %528 = vmatpush.msra.mxu1 %v503_v14 }
 0x259   :  { %529 = vmatpush.msra.mxu1 %v502_v15 }
 0x25b   :  { %530 = vmatpush.msra.mxu1 %v501_v17 }
 0x25d   :  { %531 = vmatpush.msra.mxu1 %v500_v19 }
 0x25f   :  { %532 = vmatpush.msra.mxu1 %v499_v23 }
 0x261   :  { %533 = vmatpush.msra.mxu1 %v498_v27 }
 0x2b0   :  { %v468_v10 = vpop.f32.mrf.mxu0 }
 0x2b8   :  { %v471_v22 = vpop.f32.mrf.mxu0 }
 0x2bb   :  { %v386_v0 = vpop.f32.mrf.mxu1 }
 0x2bc   :  { %444 = vmatmul.f32.vlgmr.msrb.gmra.mxu2 %v386_v0  ;;  %v580_v0 = vld [vmem:[#allocation10] sm:$0xff] }
 0x2bd   :  { %615 = vmatpush.msra.mxu2 %v580_v0 }
 0x2c3   :  { %v389_v1 = vpop.f32.mrf.mxu1 }
 0x2c4   :  { %447 = vmatmul.f32.gmra.mxu2 %v389_v1  ;;  %v648_v1 = vld [vmem:[%s1009_s12] ss:$0 sm:$0xff] }
 0x33f   :  { %v445_v11 = vpop.f32.mrf.mxu2 }
 0x340   :  { %v446_v20 = vadd.f32 %v646_v16, %v445_v11 }
 0x342   :  { %v469_v25 = vadd.f32 %v468_v10, %v446_v20 }
 0x347   :  { %v448_v18 = vpop.f32.mrf.mxu2 }
 0x348   :  { %v449_v21 = vadd.f32 %v646_v16, %v448_v18 }
 0x34a   :  { %v472_v24 = vadd.f32 %v471_v22, %v449_v21 }
 0x34c   :  { %492 = vmatpush.msra.mxu3 %v472_v24 }
 0x34e   :  { %493 = vmatpush.msra.mxu3 %v469_v25 }
 0x34f   :  { %635 = vmatmul.msk.f32.vlgmr.msra.gmra.mxu3 %vm148_vm0, %v474_v26 }
 0x350   :  { %559 = vmatpush.msrb.mxu3 %v554_v28 }
 0x352   :  { %560 = vmatpush.msrb.mxu3 %v553_v29 }
 0x354   :  { %561 = vmatpush.msrb.mxu3 %v552_v30 }
 0x356   :  { %562 = vmatpush.msrb.mxu3 %v551_v31 }
 0x358   :  { %563 = vmatpush.msrb.mxu3 %v550_v32 }
 0x35a   :  { %564 = vmatpush.msrb.mxu3 %v549_v33 }
 0x35c   :  { %565 = vmatpush.msrb.mxu3 %v548_v34 }
 0x35e   :  { %566 = vmatpush.msrb.mxu3 %v547_v35 }
 0x360   :  { %567 = vmatpush.msrb.mxu3 %v546_v36 }
 0x362   :  { %568 = vmatpush.msrb.mxu3 %v545_v37 }
 0x364   :  { %569 = vmatpush.msrb.mxu3 %v544_v38 }
 0x366   :  { %570 = vmatpush.msrb.mxu3 %v543_v39 }
 0x368   :  { %571 = vmatpush.msrb.mxu3 %v542_v40 }
 0x36a   :  { %572 = vmatpush.msrb.mxu3 %v541_v42 }
 0x36c   :  { %573 = vmatpush.msrb.mxu3 %v540_v43 }
 0x36e   :  { %574 = vmatpush.msrb.mxu3 %v539_v44 }
 0x3d2   :  { %v495_v41 = vpop.f32.mrf.mxu3 }
 0x3d3   :  { %534 = vmatmul.f32.vlgmr.msra.gmra.mxu1 %v495_v41 }
 0x450   :  { %v535_v59 = vpop.f32.mrf.mxu1 }
 0x451   :  { %v536_v60 = vadd.f32 %v647_v58, %v535_v59 }
 0x453   :  { %v538_v61 = vmax.f32 %v536_v60, 0.0 }
 0x455   :  { %575 = vmatmul.f32.vlgmr.msrb.gmra.mxu3 %v538_v61 }
 0x4d8   :  { %v576_v2 = vpop.f32.mrf.mxu3 }
 0x4d9   :  { %v577_v3 = vadd.f32 %v648_v1, %v576_v2 }
 0x4db   :  { %v579_v13 = vmax.f32 %v577_v3, 0.0 }
 0x4dd   :  { %616 = vmatmul.f32.vlgmr.msra.gmra.mxu2 %v579_v13 }
 0x560   :  { %v617_v5 = vpop.f32.mrf.mxu2 }
 0x561   :  { %v618_v6 = vadd.f32 %v649_v4, %v617_v5 }
 0x563   :  { %620 = vst [vmem:[%s1012_s15] sm:$0xff] %v618_v6 }
 0x564   :  { %625 = vsyncpa [#allocation3], 1 }
 0x565   :  { %626 = vsyncpa [#allocation5], 1 }
 0x566   :  { %627 = vsyncpa [#allocation8], 1 }
 0x567   :  { %628 = vsyncpa [#allocation11], 1 }

</bundles_post_ra>
